<compile_context>
chip_gen: v7x
topology: tpu7x:2x2x1
jax: 0.10.0
libtpu: 0.0.40
codegen_flags: <defaults>
</compile_context>

<pallas_src>
import jax
import jax.numpy as jnp
from jax import lax
from jax.experimental import pallas as pl
from jax.experimental.pallas import tpu as pltpu


# ----------------------------------------------------------------------------
# Kernel
# ----------------------------------------------------------------------------
def _mlp_kernel(x_ref, w1_ref, w2_ref, extras_ref, b3_ref, o_ref):
    # x: (tb, D) f32/bf16   w1: (D, H) bf16   w2: (H, H) bf16
    # extras: (3, H) f32 = [b1; b2; w3_row]   b3: (1,) f32 in SMEM
    x = x_ref[...]
    extras = extras_ref[...]
    b1 = extras[0:1, :]          # (1, H)
    b2 = extras[1:2, :]          # (1, H)
    w3 = extras[2:3, :]          # (1, H)

    # Layer 1: bf16 MXU inputs, f32 accumulation; bias + ReLU in f32 (VPU).
    h1 = jnp.dot(x.astype(jnp.bfloat16), w1_ref[...],
                 preferred_element_type=jnp.float32) + b1
    h1 = jnp.maximum(h1, 0.0)

    # Layer 2.
    h2 = jnp.dot(h1.astype(jnp.bfloat16), w2_ref[...],
                 preferred_element_type=jnp.float32) + b2
    h2 = jnp.maximum(h2, 0.0)

    # Layer 3 (H -> 1): contract over H of both operands via dot_general so
    # no h2.T is materialized (avoids an XLU transpose); the result lands with
    # the batch on the LANE axis -> unmasked lane-dense store.
    out_row = lax.dot_general(
        w3, h2,
        dimension_numbers=(((1,), (1,)), ((), ())),
        preferred_element_type=jnp.float32)                    # (1, tb) f32
    out_row = out_row + b3_ref[0]                              # SMEM scalar
    o_ref[...] = out_row.reshape(1, 1, -1).astype(o_ref.dtype)  # (1, 1, tb)


# ----------------------------------------------------------------------------
# Tile-size selection (generation- and VMEM-aware)
# ----------------------------------------------------------------------------
def _chip_defaults():
    """Return (tensorcores_per_chip, generation tb cap)."""
    try:
        kind = jax.devices()[0].device_kind.lower()
    except Exception:
        kind = ""
    if "v7" in kind:
        return 2, 2048          # 2 TCs share the grid's parallel axis
    if "v5" in kind and ("lite" in kind or "v5e" in kind):
        return 1, 1024          # v5e: single vst slot -> keep tiles moderate
    return 1, 2048


def _tb_cap_from_vmem(D, H, x_itemsize, budget_bytes=24 * 1024 * 1024):
    """Largest batch-tile (multiple of 128) whose per-step footprint fits a
    conservative VMEM budget (inside the 32 MiB vmem_limit_bytes)."""
    weight_bytes = 2 * (D * H * 2 + H * H * 2 + 4 * H * 4)   # ~double-buffered
    per_row = 2 * D * x_itemsize        # x tile, double-buffered
    per_row += 2 * H * 4                # h1, h2 f32 temporaries
    per_row += 2 * 4                    # output row, double-buffered
    rows = max(128, (budget_bytes - weight_bytes) // max(per_row, 1))
    return max(128, 128 * (rows // 128))


def _pick_tb(B, *, num_cores, tb_cap):
    tiles_128 = max(1, pl.cdiv(B, 128))
    if num_cores <= 1 or tiles_128 <= 1:
        # Single TensorCore: one big tile (fewer ~600-cycle grid steps).
        return min(tb_cap, 128 * tiles_128)
    # Two TensorCores: smallest even tile count whose tile size fits the cap,
    # so the parallel grid axis splits evenly across cores.
    n = 2
    while True:
        tb = 128 * pl.cdiv(tiles_128, n)
        if tb <= tb_cap or tb == 128:
            return tb
        n += 2


# ----------------------------------------------------------------------------
# Wrapper
# ----------------------------------------------------------------------------
def _prep_params(params):
    H = params["w1"].shape[1]
    w1 = params["w1"].astype(jnp.bfloat16)
    w2 = params["w2"].astype(jnp.bfloat16)
    extras = jnp.concatenate(
        [params["b1"].reshape(1, H).astype(jnp.float32),
         params["b2"].reshape(1, H).astype(jnp.float32),
         params["w3"].reshape(1, H).astype(jnp.float32)], axis=0)   # (3, H)
    b3 = params["b3"].reshape(-1).astype(jnp.float32)               # (1,)
    return {"w1": w1, "w2": w2, "extras": extras, "b3": b3}


def _run_tiles(x, prep, tb, num_tiles):
    """Run the fused MLP on the first num_tiles*tb rows of x (all in-bounds)."""
    N, D = x.shape
    H = prep["w2"].shape[0]
    assert tb % 128 == 0
    assert num_tiles * tb <= N

    def full(shape):
        return pl.BlockSpec(shape, lambda i: (0,) * len(shape))

    out3 = pl.pallas_call(
        _mlp_kernel,
        out_shape=jax.ShapeDtypeStruct((num_tiles, 1, tb), x.dtype),
        grid_spec=pltpu.PrefetchScalarGridSpec(
            num_scalar_prefetch=0,
            grid=(num_tiles,),
            in_specs=[
                pl.BlockSpec((tb, D), lambda i: (i, 0)),            # x tile
                full((D, H)),                                       # w1 (bf16)
                full((H, H)),                                       # w2 (bf16)
                full((3, H)),                                       # b1/b2/w3
                pl.BlockSpec(memory_space=pltpu.MemorySpace.SMEM),  # b3 scalar
            ],
            out_specs=pl.BlockSpec((1, 1, tb), lambda i: (i, 0, 0)),
        ),
        compiler_params=pltpu.CompilerParams(
            dimension_semantics=("parallel",),
            vmem_limit_bytes=32 * 1024 * 1024,
        ),
    )(x, prep["w1"], prep["w2"], prep["extras"], prep["b3"])
    return out3.reshape(num_tiles * tb, 1)


def angle_predictor_forward(x, params, *, tb=None):
    """Pallas forward for AnglePredictor. x: (B, hidden_dim), f32 or bf16."""
    B, D = x.shape
    H = params["w1"].shape[1]
    prep = _prep_params(params)

    num_cores, gen_cap = _chip_defaults()
    cap = min(gen_cap, _tb_cap_from_vmem(D, H, jnp.dtype(x.dtype).itemsize))
    if tb is None:
        tb = _pick_tb(B, num_cores=num_cores, tb_cap=cap)
    tb = max(128, 128 * (tb // 128))

    if B % tb == 0:
        return _run_tiles(x, prep, tb, B // tb)

    if B <= 1024 or B < tb:
        # Small/mid batch: single padded call (cheap copy, keeps both v7x
        # tiles in one call for core balance).
        n_tiles = pl.cdiv(B, tb)
        xp = jnp.pad(x, ((0, n_tiles * tb - B), (0, 0)))
        return _run_tiles(xp, prep, tb, n_tiles)[:B]

    # Large non-divisible batch: read the tb-divisible prefix straight from x
    # (no whole-array pad/copy), pad only the small tail slice.
    n_main = B // tb
    out_main = _run_tiles(x, prep, tb, n_main)          # first n_main*tb rows
    rem = B - n_main * tb
    tb_tail = 128 * pl.cdiv(rem, 128)
    tail = x[n_main * tb:]
    if tb_tail != rem:
        tail = jnp.pad(tail, ((0, tb_tail - rem), (0, 0)))
    out_tail = _run_tiles(tail, prep, tb_tail, 1)[:rem]
    return jnp.concatenate([out_main, out_tail], axis=0)


# ----------------------------------------------------------------------------
# Params / references
# ----------------------------------------------------------------------------
def init_params(key, hidden_dim, hidden_size=128, dtype=jnp.float32):
    """Deterministic synthetic init (uniform, PyTorch-Linear-like bounds).
    Weights stored as (in_features, out_features) so forward is x @ W + b."""
    ks = jax.random.split(key, 6)

    def lin(kw, kb, fan_in, fan_out):
        bound = 1.0 / jnp.sqrt(fan_in)
        w = jax.random.uniform(kw, (fan_in, fan_out), dtype, -bound, bound)
        b = jax.random.uniform(kb, (1, fan_out), dtype, -bound, bound)
        return w, b

    w1, b1 = lin(ks[0], ks[1], hidden_dim, hidden_size)
    w2, b2 = lin(ks[2], ks[3], hidden_size, hidden_size)
    w3, b3 = lin(ks[4], ks[5], hidden_size, 1)
    return {"w1": w1, "b1": b1, "w2": w2, "b2": b2, "w3": w3, "b3": b3}


def reference_forward(x, p):
    """Pure-JAX reference with the same numerics as the kernel
    (bf16 MXU inputs, f32 accumulation, f32 final layer)."""
    w1 = p["w1"].astype(jnp.bfloat16)
    w2 = p["w2"].astype(jnp.bfloat16)
    h1 = jnp.maximum(
        jnp.dot(x.astype(jnp.bfloat16), w1,
                preferred_element_type=jnp.float32) + p["b1"], 0.0)
    h2 = jnp.maximum(
        jnp.dot(h1.astype(jnp.bfloat16), w2,
                preferred_element_type=jnp.float32) + p["b2"], 0.0)
    return jnp.dot(h2, p["w3"], preferred_element_type=jnp.float32) + p["b3"]


def reference_forward_f32(x, p):
    """Exact f32 semantics of the original PyTorch module."""
    h1 = jnp.maximum(x @ p["w1"] + p["b1"], 0.0)
    h2 = jnp.maximum(h1 @ p["w2"] + p["b2"], 0.0)
    return h2 @ p["w3"] + p["b3"]


# ----------------------------------------------------------------------------
# Self-test
# ----------------------------------------------------------------------------
if __name__ == "__main__":
    key = jax.random.PRNGKey(0)
    k_x, k_p = jax.random.split(key)

    batch, hidden_dim, hidden_size = 8, 32, 128
    params = init_params(k_p, hidden_dim, hidden_size)

    # Small batch (single padded tile).
    x = jax.random.normal(k_x, (batch, hidden_dim), dtype=jnp.float32)
    out = jax.block_until_ready(angle_predictor_forward(x, params))
    assert out.shape == (batch, 1)
    assert jnp.allclose(out, reference_forward(x, params), atol=1e-3, rtol=1e-3)
    assert jnp.allclose(out, reference_forward_f32(x, params), atol=2e-2, rtol=2e-2)

    # Non-divisible mid batch (padded single call; 1 or 2 tiles by chip gen).
    x2 = jax.random.normal(k_x, (300, hidden_dim), dtype=jnp.float32)
    out2 = jax.block_until_ready(angle_predictor_forward(x2, params))
    assert out2.shape == (300, 1)
    assert jnp.allclose(out2, reference_forward(x2, params), atol=1e-3, rtol=1e-3)

    # Large non-divisible batch: exercises the prefix + padded-tail split
    # (no whole-array pad).
    x3 = jax.random.normal(k_x, (2500, hidden_dim), dtype=jnp.float32)
    out3 = jax.block_until_ready(angle_predictor_forward(x3, params))
    assert out3.shape == (2500, 1)
    assert jnp.allclose(out3, reference_forward(x3, params), atol=1e-3, rtol=1e-3)

    # bf16 input path (accepted directly, no wrapper-side cast).
    xb = x.astype(jnp.bfloat16)
    outb = jax.block_until_ready(angle_predictor_forward(xb, params))
    assert outb.shape == (batch, 1)
    assert jnp.allclose(outb.astype(jnp.float32),
                        reference_forward_f32(x, params), atol=5e-2, rtol=5e-2)

    print("KERNEL_OK")
</pallas_src>

<mosaic_0001>
module attributes {stable_mosaic.version = 11 : i64} {
  func.func @_mlp_kernel(%arg0: i32, %arg1: memref<128x32xf32, #tpu.memory_space<vmem>>, %arg2: memref<32x128xbf16, #tpu.memory_space<vmem>>, %arg3: memref<128x128xbf16, #tpu.memory_space<vmem>>, %arg4: memref<3x128xf32, #tpu.memory_space<vmem>>, %arg5: memref<1xf32, #tpu.memory_space<smem>>, %arg6: memref<1x1x128xf32, #tpu.memory_space<vmem>>) attributes {dimension_semantics = [#tpu.dimension_semantics<parallel>], iteration_bounds = array<i64: 1>, scalar_prefetch = 0 : i64, scratch_operands = 0 : i64, tpu.core_type = #tpu.core_type<tc>, window_params = [{transform_indices = @transform_0, window_bounds = array<i64: 128, 32>}, {pipeline_mode = #tpu.pipeline_mode<synchronous>, transform_indices = @transform_1, window_bounds = array<i64: 32, 128>}, {pipeline_mode = #tpu.pipeline_mode<synchronous>, transform_indices = @transform_2, window_bounds = array<i64: 128, 128>}, {pipeline_mode = #tpu.pipeline_mode<synchronous>, transform_indices = @transform_3, window_bounds = array<i64: 3, 128>}, {transform_indices = @transform_4, window_bounds = array<i64: 1>}, {transform_indices = @transform_5, window_bounds = array<i64: 1, 1, 128>}]} {
    %c0 = arith.constant 0 : index
    %c0_0 = arith.constant 0 : index
    %0 = vector.load %arg1[%c0, %c0_0] : memref<128x32xf32, #tpu.memory_space<vmem>>, vector<128x32xf32>
    %c0_1 = arith.constant 0 : index
    %c0_2 = arith.constant 0 : index
    %1 = vector.load %arg4[%c0_1, %c0_2] : memref<3x128xf32, #tpu.memory_space<vmem>>, vector<3x128xf32>
    %2 = vector.extract_strided_slice %1 {offsets = [0, 0], sizes = [1, 128], strides = [1, 1]} : vector<3x128xf32> to vector<1x128xf32>
    %3 = vector.extract_strided_slice %1 {offsets = [1, 0], sizes = [1, 128], strides = [1, 1]} : vector<3x128xf32> to vector<1x128xf32>
    %4 = vector.extract_strided_slice %1 {offsets = [2, 0], sizes = [1, 128], strides = [1, 1]} : vector<3x128xf32> to vector<1x128xf32>
    %5 = arith.truncf %0 : vector<128x32xf32> to vector<128x32xbf16>
    %c0_3 = arith.constant 0 : index
    %c0_4 = arith.constant 0 : index
    %6 = vector.load %arg2[%c0_3, %c0_4] : memref<32x128xbf16, #tpu.memory_space<vmem>>, vector<32x128xbf16>
    %cst = arith.constant dense<0.000000e+00> : vector<128x128xf32>
    %7 = tpu.matmul %5, %6, %cst {dimension_numbers = #tpu.dot_dimension_numbers<[1], [0], [0], [1], [0, 0, 1, 1], [], []>} : vector<128x32xbf16>, vector<32x128xbf16>, vector<128x128xf32> -> vector<128x128xf32>
    %8 = vector.broadcast %2 : vector<1x128xf32> to vector<128x128xf32>
    %9 = arith.addf %7, %8 : vector<128x128xf32>
    %cst_5 = arith.constant 0.000000e+00 : f32
    %10 = vector.broadcast %cst_5 : f32 to vector<128x128xf32>
    %11 = arith.maximumf %9, %10 : vector<128x128xf32>
    %12 = arith.truncf %11 : vector<128x128xf32> to vector<128x128xbf16>
    %c0_6 = arith.constant 0 : index
    %c0_7 = arith.constant 0 : index
    %13 = vector.load %arg3[%c0_6, %c0_7] : memref<128x128xbf16, #tpu.memory_space<vmem>>, vector<128x128xbf16>
    %cst_8 = arith.constant dense<0.000000e+00> : vector<128x128xf32>
    %14 = tpu.matmul %12, %13, %cst_8 {dimension_numbers = #tpu.dot_dimension_numbers<[1], [0], [0], [1], [0, 0, 1, 1], [], []>} : vector<128x128xbf16>, vector<128x128xbf16>, vector<128x128xf32> -> vector<128x128xf32>
    %15 = vector.broadcast %3 : vector<1x128xf32> to vector<128x128xf32>
    %16 = arith.addf %14, %15 : vector<128x128xf32>
    %cst_9 = arith.constant 0.000000e+00 : f32
    %17 = vector.broadcast %cst_9 : f32 to vector<128x128xf32>
    %18 = arith.maximumf %16, %17 : vector<128x128xf32>
    %cst_10 = arith.constant dense<0.000000e+00> : vector<1x128xf32>
    %19 = tpu.matmul %4, %18, %cst_10 {dimension_numbers = #tpu.dot_dimension_numbers<[1], [1], [0], [0], [0, 0, 1, 0], [], []>} : vector<1x128xf32>, vector<128x128xf32>, vector<1x128xf32> -> vector<1x128xf32>
    %c0_11 = arith.constant 0 : index
    %20 = memref.load %arg5[%c0_11] : memref<1xf32, #tpu.memory_space<smem>>
    %21 = vector.broadcast %20 : f32 to vector<1x128xf32>
    %22 = arith.addf %19, %21 : vector<1x128xf32>
    %23 = vector.shape_cast %22 : vector<1x128xf32> to vector<1x1x128xf32>
    %c0_12 = arith.constant 0 : index
    %c0_13 = arith.constant 0 : index
    %c0_14 = arith.constant 0 : index
    %24 = vector.load %arg6[%c0_12, %c0_13, %c0_14] : memref<1x1x128xf32, #tpu.memory_space<vmem>>, vector<1x1x128xf32>
    tpu.vector_store %arg6[%c0_12, %c0_13, %c0_14], %23 {strides = array<i32>} : memref<1x1x128xf32, #tpu.memory_space<vmem>>, vector<1x1x128xf32>,
    return
  }
  func.func @transform_0(%arg0: i32) -> (i32, i32) {
    %c0_i32 = arith.constant 0 : i32
    %c0_i32_0 = arith.constant 0 : i32
    return %arg0, %c0_i32 : i32, i32
  }
  func.func @transform_1(%arg0: i32) -> (i32, i32) {
    %c0_i32 = arith.constant 0 : i32
    %c0_i32_0 = arith.constant 0 : i32
    %c0_i32_1 = arith.constant 0 : i32
    return %c0_i32, %c0_i32_0 : i32, i32
  }
  func.func @transform_2(%arg0: i32) -> (i32, i32) {
    %c0_i32 = arith.constant 0 : i32
    %c0_i32_0 = arith.constant 0 : i32
    %c0_i32_1 = arith.constant 0 : i32
    return %c0_i32, %c0_i32_0 : i32, i32
  }
  func.func @transform_3(%arg0: i32) -> (i32, i32) {
    %c0_i32 = arith.constant 0 : i32
    %c0_i32_0 = arith.constant 0 : i32
    %c0_i32_1 = arith.constant 0 : i32
    return %c0_i32, %c0_i32_0 : i32, i32
  }
  func.func @transform_4(%arg0: i32) -> i32 {
    %c0_i32 = arith.constant 0 : i32
    %c0_i32_0 = arith.constant 0 : i32
    return %c0_i32 : i32
  }
  func.func @transform_5(%arg0: i32) -> (i32, i32, i32) {
    %c0_i32 = arith.constant 0 : i32
    %c0_i32_0 = arith.constant 0 : i32
    %c0_i32_1 = arith.constant 0 : i32
    return %arg0, %c0_i32, %c0_i32_0 : i32, i32, i32
  }
}

</mosaic_0001>

<bundles_post_ra>
// kernel: tpu_custom_call.1
= control target key start
LH: loop header
LB: loop body
LE: loop exit
PB: predicated region body
PF: predicated region fallthrough
CT: control target
= control target key end

     0   :  { %vm68_vm0 = vcmask 261120   ;;  %s850_s0 = inlined_call_operand.vmem [shape: f32[128,32], index: 0, kind: input, shape index: {}]   ;;  %s851_s1 = inlined_call_operand.vmem [shape: bf16[32,128], index: 1, kind: input, shape index: {}]   ;;  %s852_s2 = inlined_call_operand.vmem [shape: bf16[128,128], index: 2, kind: input, shape index: {}]   ;;  %s853_s3 = inlined_call_operand.vmem [shape: f32[3,128], index: 3, kind: input, shape index: {}]   ;;  %s854_s4 = inlined_call_operand.<no memory space> [shape: f32[1], index: 4, kind: input, shape index: {}]   ;;  %s855_s5 = inlined_call_operand.hbm [shape: f32[1,1,128], index: 5, kind: output, shape index: {}]  }
   0x1   :  { %v661_v0 = vld [vmem:[%s851_s1] sm:$0xff]   ;;  %v662_v1 = vld [vmem:[%s851_s1 + $0x8] sm:$0xff]   ;;  %v25_v5 = vld [vmem:[%s850_s0 + $0x10] sm:$0xff] }
   0x2   :  { %546 = vmatprep.subr.bf16.mxu1 %v661_v0  ;;  %v23_v2 = vld [vmem:[%s850_s0] sm:$0xff]  ;;  %v24_v3 = vld [vmem:[%s850_s0 + $0x8] sm:$0xff]  ;;  %v26_v6 = vld [vmem:[%s850_s0 + $0x18] sm:$0xff] }
   0x3   :  { %547 = vmatpush3.bf16.msra.mxu1 %v661_v0  ;;  %v40_v4 = vpack.c.bf16 %v24_v3, %v23_v2  ;;  %v27_v7 = vld [vmem:[%s850_s0 + $0x20] sm:$0xff]  ;;  %v28_v8 = vld [vmem:[%s850_s0 + $0x28] sm:$0xff]  ;;  %v41_v9 = vpack.c.bf16 %v26_v6, %v25_v5  ;;  %v29_v12 = vld [vmem:[%s850_s0 + $0x30] sm:$0xff] }
   0x4   :  { %548 = vmatprep.subr.bf16.mxu1 %v662_v1  ;;  %v42_v10 = vpack.c.bf16 %v28_v8, %v27_v7  ;;  %v663_v11 = vld [vmem:[%s852_s2] sm:$0xff]   ;;  %v30_v13 = vld [vmem:[%s850_s0 + $0x38] sm:$0xff]  ;;  %v664_v14 = vld [vmem:[%s852_s2 + $0x8] sm:$0xff]  }
   0x5   :  { %550 = vmatprep.mubr.msk.bf16.mxu1 %vm68_vm0, %v40_v4  ;;  %v31_v15 = vld [vmem:[%s850_s0 + $0x40] sm:$0xff]  ;;  %v32_v16 = vld [vmem:[%s850_s0 + $0x48] sm:$0xff]  ;;  %v665_v17 = vld [vmem:[%s852_s2 + $0x10] sm:$0xff]   ;;  %v43_v18 = vpack.c.bf16 %v30_v13, %v29_v12 }
   0x6   :  { %v44_v19 = vpack.c.bf16 %v32_v16, %v31_v15 }
   0x7   :  { %549 = vmatpush3.bf16.msra.mxu1 %v662_v1 }
   0x8   :  { %566 = vmatprep.subr.bf16.mxu1 %v663_v11 }
   0xa   :  { %551 = vmatmul.mubr.msk.bf16.vlgmr.msra.gmra.mrb[0].mxu1 %vm68_vm0, %v41_v9 }
   0xb   :  { %554 = vmatprep.mubr.msk.bf16.mxu1 %vm68_vm0, %v42_v10  ;;  %567 = vmatpush3.bf16.msra.mxu1 %v663_v11 }
   0xc   :  { %568 = vmatprep.subr.bf16.mxu1 %v664_v14 }
   0xf   :  { %569 = vmatpush3.bf16.msra.mxu1 %v664_v14 }
  0x10   :  { %11 = vsyncpa [#allocation4], 0  ;;  %570 = vmatprep.subr.bf16.mxu1 %v665_v17  ;;  %v666_v20 = vld [vmem:[%s852_s2 + $0x18] sm:$0xff]   ;;  %v33_v21 = vld [vmem:[%s850_s0 + $0x50] sm:$0xff]  ;;  %v52_v34 = vlaneseq  ;;  %vm696_vm1 = vmmov 0   ;;  %s698_s19 = smov [#allocation3]  }
  0x11   :  { %v34_v22 = vld [vmem:[%s850_s0 + $0x58] sm:$0xff]  ;;  %v35_v23 = vld [vmem:[%s850_s0 + $0x60] sm:$0xff]  ;;  %v36_v24 = vld [vmem:[%s850_s0 + $0x68] sm:$0xff]  ;;  %s477_s20 = sshll.u32 %s698_s19, 4  ;;  %s478_s20 = int_to_ptr.vmem [resolvable:$true] %s477_s20 }
  0x12   :  { %555 = vmatmul.mubr.msk.bf16.gmra.mrb[4].mxu1 %vm68_vm0, %v43_v18  ;;  %v667_v25 = vld [vmem:[%s852_s2 + $0x20] sm:$0xff]   ;;  %v45_v26 = vpack.c.bf16 %v34_v22, %v33_v21  ;;  %v46_v27 = vpack.c.bf16 %v36_v24, %v35_v23  ;;  %v668_v28 = vld [vmem:[%s852_s2 + $0x28] sm:$0xff]   ;;  %v37_v29 = vld [vmem:[%s850_s0 + $0x70] sm:$0xff]  ;;  %v815_v35 = vshrl.u32 %v52_v34, 7  ;;  %s671_s21 = scalar_lea.vmem %s478_s20, 16  ;;  %s675_s22 = scalar_lea.vmem %s478_s20, 32 }
  0x13   :  { %558 = vmatprep.mubr.msk.bf16.mxu1 %vm68_vm0, %v44_v19  ;;  %571 = vmatpush3.bf16.msra.mxu1 %v665_v17  ;;  %v38_v30 = vld [vmem:[%s850_s0 + $0x78] sm:$0xff]  ;;  %v669_v32 = vld [vmem:[%s852_s2 + $0x30] sm:$0xff]   ;;  %v821_v37 = vld [vmem:[%s853_s3] sm:$0x7]  ;;  %p672_p0 = scmp.ne.s32.totalorder %s478_s20, %s671_s21  ;;  %p676_p1 = scmp.lt.s32.totalorder %s478_s20, %s478_s20 }
  0x14   :  { %572 = vmatprep.subr.bf16.mxu1 %v666_v20  ;;  %v47_v31 = vpack.c.bf16 %v38_v30, %v37_v29  ;;  %v670_v33 = vld [vmem:[%s852_s2 + $0x38] sm:$0xff]   ;;  %v54_v36 = vsub.s32 0, %v815_v35  ;;  %p677_p2 = scmp.lt.s32.totalorder %s675_s22, %s671_s21 }
  0x16   :  { %v55_v38 = vrot.slane %v821_v37, %v54_v36  ;;  %p678_p3 = por %p677_p2, %p676_p1 }
  0x17   :  { %573 = vmatpush3.bf16.msra.mxu1 %v666_v20 }
  0x18   :  { %574 = vmatprep.subr.bf16.mxu1 %v667_v25  ;;  %p679_p4 = pnand %p678_p3, %p672_p0 }
  0x1a   :  { %559 = vmatmul.mubr.msk.bf16.gmra.mrb[8].mxu1 %vm68_vm0, %v45_v26 }
  0x1b   :  { %562 = vmatprep.mubr.msk.bf16.mxu1 %vm68_vm0, %v46_v27  ;;  %575 = vmatpush3.bf16.msra.mxu1 %v667_v25 }
  0x1c   :  { %576 = vmatprep.subr.bf16.mxu1 %v668_v28 }
  0x1f   :  { %577 = vmatpush3.bf16.msra.mxu1 %v668_v28 }
  0x20   :  { %578 = vmatprep.subr.bf16.mxu1 %v669_v32 }
  0x22   :  { %563 = vmatmul.mubr.msk.bf16.gmra.mrb[12].mxu1 %vm68_vm0, %v47_v31  ;;  %v695_v31 = vmov 0.0|0.0  }
  0x23   :  { %579 = vmatpush3.bf16.msra.mxu1 %v669_v32  ;;  %633 = vmatprep.subr.bf16.mxu0 %v695_v31  ;;  %v697_v32 = vmov 0.0  }
  0x24   :  { %580 = vmatprep.subr.bf16.mxu1 %v670_v33  ;;  %630 = vmatprep.mubr.msk.f32.mxu0 %vm696_vm1, %v697_v32 }
  0x27   :  { %581 = vmatpush3.bf16.msra.mxu1 %v670_v33  ;;  %v232_v33 = vsub.s32 1, %v815_v35 }
  0x29   :  { %v233_v34 = vrot.slane %v821_v37, %v232_v33 }
  0xdd   :  { %v552_v39 = vpop.f32.mrb[0].mxu1 }
  0xde   :  { %v136_v40 = vadd.f32 %v552_v39, %v55_v38  ;;  %v127_v41 = vpop.f32.mrb[1].mxu1 }
  0xdf   :  { %v128_v42 = vadd.f32 %v127_v41, %v55_v38  ;;  %v553_v43 = vpop.f32.mrb[2].mxu1 }
  0xe0   :  { %v139_v44 = vadd.f32 %v553_v43, %v55_v38  ;;  %v130_v45 = vpop.f32.mrb[3].mxu1  ;;  %v192_v47 = vmax.f32 %v136_v40, 0.0 }
  0xe1   :  { %v131_v46 = vadd.f32 %v130_v45, %v55_v38  ;;  %v190_v49 = vmax.f32 %v128_v42, 0.0 }
  0xe2   :  { %v193_v48 = vmax.f32 %v139_v44, 0.0 }
  0xe3   :  { %v191_v50 = vmax.f32 %v131_v46, 0.0 }
  0xe4   :  { %v207_v51 = vpack.c.bf16 %v193_v48, %v192_v47 }
  0xe5   :  { %v206_v52 = vpack.c.bf16 %v191_v50, %v190_v49  ;;  %v556_v53 = vpop.f32.mrb[4].mxu1 }
  0xe6   :  { %v152_v54 = vadd.f32 %v556_v53, %v55_v38  ;;  %v143_v55 = vpop.f32.mrb[5].mxu1 }
  0xe7   :  { %v144_v56 = vadd.f32 %v143_v55, %v55_v38  ;;  %582 = vmatprep.mubr.bf16.mxu1 %v206_v52  ;;  %v557_v57 = vpop.f32.mrb[6].mxu1 }
  0xe8   :  { %v196_v58 = vmax.f32 %v152_v54, 0.0  ;;  %v155_v59 = vadd.f32 %v557_v57, %v55_v38  ;;  %583 = vmatmul.mubr.bf16.vlgmr.msra.gmra.mrb[16].mxu1 %v207_v51  ;;  %v146_v60 = vpop.f32.mrb[7].mxu1 }
  0xe9   :  { %v194_v61 = vmax.f32 %v144_v56, 0.0  ;;  %v147_v62 = vadd.f32 %v146_v60, %v55_v38 }
  0xea   :  { %v197_v63 = vmax.f32 %v155_v59, 0.0 }
  0xeb   :  { %v195_v0 = vmax.f32 %v147_v62, 0.0 }
  0xec   :  { %v209_v1 = vpack.c.bf16 %v197_v63, %v196_v58 }
  0xed   :  { %v208_v2 = vpack.c.bf16 %v195_v0, %v194_v61  ;;  %v560_v3 = vpop.f32.mrb[8].mxu1 }
  0xee   :  { %v168_v4 = vadd.f32 %v560_v3, %v55_v38  ;;  %v159_v5 = vpop.f32.mrb[9].mxu1 }
  0xef   :  { %586 = vmatprep.mubr.bf16.mxu1 %v208_v2  ;;  %v160_v6 = vadd.f32 %v159_v5, %v55_v38  ;;  %v561_v7 = vpop.f32.mrb[10].mxu1 }
  0xf0   :  { %587 = vmatmul.mubr.bf16.gmra.mrb[20].mxu1 %v209_v1  ;;  %v200_v8 = vmax.f32 %v168_v4, 0.0  ;;  %v171_v9 = vadd.f32 %v561_v7, %v55_v38  ;;  %v162_v10 = vpop.f32.mrb[11].mxu1 }
  0xf1   :  { %v198_v11 = vmax.f32 %v160_v6, 0.0  ;;  %v163_v12 = vadd.f32 %v162_v10, %v55_v38 }
  0xf2   :  { %v201_v13 = vmax.f32 %v171_v9, 0.0 }
  0xf3   :  { %v199_v14 = vmax.f32 %v163_v12, 0.0 }
  0xf4   :  { %v211_v15 = vpack.c.bf16 %v201_v13, %v200_v8 }
  0xf5   :  { %v210_v16 = vpack.c.bf16 %v199_v14, %v198_v11  ;;  %v564_v17 = vpop.f32.mrb[12].mxu1 }
  0xf6   :  { %v184_v18 = vadd.f32 %v564_v17, %v55_v38  ;;  %v175_v19 = vpop.f32.mrb[13].mxu1 }
  0xf7   :  { %590 = vmatprep.mubr.bf16.mxu1 %v210_v16  ;;  %v176_v20 = vadd.f32 %v175_v19, %v55_v38  ;;  %v565_v21 = vpop.f32.mrb[14].mxu1 }
  0xf8   :  { %591 = vmatmul.mubr.bf16.gmra.mrb[24].mxu1 %v211_v15  ;;  %v204_v22 = vmax.f32 %v184_v18, 0.0  ;;  %v187_v23 = vadd.f32 %v565_v21, %v55_v38  ;;  %v178_v24 = vpop.f32.mrb[15].mxu1 }
  0xf9   :  { %v202_v25 = vmax.f32 %v176_v20, 0.0  ;;  %v179_v26 = vadd.f32 %v178_v24, %v55_v38 }
  0xfa   :  { %v205_v27 = vmax.f32 %v187_v23, 0.0 }
  0xfb   :  { %v203_v28 = vmax.f32 %v179_v26, 0.0 }
  0xfc   :  { %v213_v29 = vpack.c.bf16 %v205_v27, %v204_v22 }
  0xfd   :  { %v212_v30 = vpack.c.bf16 %v203_v28, %v202_v25  ;;  %v398_v28 = vrot.slane %v821_v37, 2 }
  0xff   :  { %594 = vmatprep.mubr.bf16.mxu1 %v212_v30 }
 0x100   :  { %595 = vmatmul.mubr.bf16.gmra.mrb[28].mxu1 %v213_v29  ;;  %v396_v29 = vstv %s854_s4 }
 0x1bb   :  { %v584_v36 = vpop.f32.mrb[16].mxu1 }
 0x1bc   :  { %v325_v39 = vadd.f32 %v584_v36, %v233_v34  ;;  %v316_v40 = vpop.f32.mrb[17].mxu1 }
 0x1bd   :  { %v317_v38 = vadd.f32 %v316_v40, %v233_v34  ;;  %v585_v41 = vpop.f32.mrb[18].mxu1 }
 0x1be   :  { %v328_v42 = vadd.f32 %v585_v41, %v233_v34  ;;  %v319_v43 = vpop.f32.mrb[19].mxu1  ;;  %v381_v45 = vmax.f32 %v325_v39, 0.0 }
 0x1bf   :  { %v320_v44 = vadd.f32 %v319_v43, %v233_v34  ;;  %v379_v47 = vmax.f32 %v317_v38, 0.0 }
 0x1c0   :  { %v382_v46 = vmax.f32 %v328_v42, 0.0 }
 0x1c1   :  { %v380_v48 = vmax.f32 %v320_v44, 0.0 }
 0x1c2   :  { %v637_v49 = vpack.c.bf16 %v382_v46, %v381_v45 }
 0x1c3   :  { %v588_v50 = vpop.f32.mrb[20].mxu1  ;;  %v634_v51 = vpack.c.bf16 %v380_v48, %v379_v47 }
 0x1c4   :  { %v341_v52 = vadd.f32 %v588_v50, %v233_v34  ;;  %v332_v53 = vpop.f32.mrb[21].mxu1 }
 0x1c5   :  { %v333_v35 = vadd.f32 %v332_v53, %v233_v34  ;;  %635 = vmatpush3.bf16.xpose.msra.mxu0 %v634_v51  ;;  %v589_v54 = vpop.f32.mrb[22].mxu1 }
 0x1c6   :  { %v385_v55 = vmax.f32 %v341_v52, 0.0  ;;  %v344_v56 = vadd.f32 %v589_v54, %v233_v34  ;;  %v335_v57 = vpop.f32.mrb[23].mxu1  ;;  %636 = vmatprep.subr.bf16.mxu0 %v695_v31 }
 0x1c7   :  { %v383_v58 = vmax.f32 %v333_v35, 0.0  ;;  %v336_v59 = vadd.f32 %v335_v57, %v233_v34 }
 0x1c8   :  { %v386_v60 = vmax.f32 %v344_v56, 0.0 }
 0x1c9   :  { %v384_v61 = vmax.f32 %v336_v59, 0.0 }
 0x1ca   :  { %v643_v62 = vpack.c.bf16 %v386_v60, %v385_v55 }
 0x1cb   :  { %v640_v63 = vpack.c.bf16 %v384_v61, %v383_v58  ;;  %v592_v0 = vpop.f32.mrb[24].mxu1 }
 0x1cc   :  { %v357_v1 = vadd.f32 %v592_v0, %v233_v34  ;;  %v348_v2 = vpop.f32.mrb[25].mxu1 }
 0x1cd   :  { %638 = vmatpush3.bf16.xpose.msra.mxu0 %v637_v49  ;;  %v349_v3 = vadd.f32 %v348_v2, %v233_v34  ;;  %v593_v4 = vpop.f32.mrb[26].mxu1 }
 0x1ce   :  { %v389_v5 = vmax.f32 %v357_v1, 0.0  ;;  %639 = vmatprep.subr.bf16.mxu0 %v695_v31  ;;  %v360_v6 = vadd.f32 %v593_v4, %v233_v34  ;;  %v351_v7 = vpop.f32.mrb[27].mxu1 }
 0x1cf   :  { %v387_v8 = vmax.f32 %v349_v3, 0.0  ;;  %v352_v9 = vadd.f32 %v351_v7, %v233_v34 }
 0x1d0   :  { %v390_v10 = vmax.f32 %v360_v6, 0.0 }
 0x1d1   :  { %v388_v11 = vmax.f32 %v352_v9, 0.0 }
 0x1d2   :  { %v649_v12 = vpack.c.bf16 %v390_v10, %v389_v5 }
 0x1d3   :  { %v646_v13 = vpack.c.bf16 %v388_v11, %v387_v8  ;;  %v596_v14 = vpop.f32.mrb[28].mxu1 }
 0x1d4   :  { %v373_v15 = vadd.f32 %v596_v14, %v233_v34  ;;  %v364_v16 = vpop.f32.mrb[29].mxu1 }
 0x1d5   :  { %641 = vmatpush3.bf16.xpose.msra.mxu0 %v640_v63  ;;  %v365_v17 = vadd.f32 %v364_v16, %v233_v34  ;;  %v597_v18 = vpop.f32.mrb[30].mxu1 }
 0x1d6   :  { %642 = vmatprep.subr.bf16.mxu0 %v695_v31  ;;  %v393_v19 = vmax.f32 %v373_v15, 0.0  ;;  %v376_v20 = vadd.f32 %v597_v18, %v233_v34  ;;  %v367_v21 = vpop.f32.mrb[31].mxu1 }
 0x1d7   :  { %v391_v22 = vmax.f32 %v365_v17, 0.0  ;;  %v368_v23 = vadd.f32 %v367_v21, %v233_v34 }
 0x1d8   :  { %v394_v24 = vmax.f32 %v376_v20, 0.0 }
 0x1d9   :  { %v392_v25 = vmax.f32 %v368_v23, 0.0 }
 0x1da   :  { %v655_v26 = vpack.c.bf16 %v394_v24, %v393_v19 }
 0x1db   :  { %v652_v27 = vpack.c.bf16 %v392_v25, %v391_v22 }
 0x1dd   :  { %644 = vmatpush3.bf16.xpose.msra.mxu0 %v643_v62 }
 0x1de   :  { %645 = vmatprep.subr.bf16.mxu0 %v695_v31 }
 0x1e5   :  { %647 = vmatpush3.bf16.xpose.msra.mxu0 %v646_v13 }
 0x1e6   :  { %648 = vmatprep.subr.bf16.mxu0 %v695_v31 }
 0x1ed   :  { %650 = vmatpush3.bf16.xpose.msra.mxu0 %v649_v12 }
 0x1ee   :  { %651 = vmatprep.subr.bf16.mxu0 %v695_v31 }
 0x1f5   :  { %653 = vmatpush3.bf16.xpose.msra.mxu0 %v652_v27 }
 0x1f6   :  { %654 = vmatprep.subr.bf16.mxu0 %v695_v31 }
 0x1fd   :  { %656 = vmatpush3.bf16.xpose.msra.mxu0 %v655_v26 }
 0x204   :  { %631 = vmatmul.mubr.f32.vlgmr.msra.gmra.mrb[0].mxu0 %v398_v28 }
 0x2d7   :  { %v466_v30 = vpop.f32.mrb[0].mxu0 }
 0x2d8   :  { %v467_v32 = vadd.f32 %v466_v30, %v396_v29  ;;  %v632_v33 = vpop.f32.mrb[1].mxu0 }
 0x2da   :  { %470 = vst [vmem:[#allocation3] sm:$0x1] %v467_v32 }
 0x2db   :  { %682 = shalt.err (!%p679_p4)
}
 0x2dc   :  { %s683_s25 = scalar_lea.hbm %s855_s5, 16 }
 0x2dd   :  { %p684_p5 = scmp.ne.s32.totalorder %s855_s5, %s683_s25  ;;  %p687_p6 = scmp.lt.u32.totalorder %s683_s25, %s855_s5 }
 0x2df   :  { %p689_p7 = pnand %p687_p6, %p684_p5 }
 0x2e1   :  { %692 = shalt.err (!%p689_p7)
}
 0x2e2   :  { %480 = dma.vmem_to_hbm [thread:$0]  %s478_s20, 16, %s855_s5, [#allocation4]  }
 0x2e3   :  { %693 = dma.done.wait [#allocation4], 16  }
 0x2e4   :  { %694 = vsyncadd [#allocation4], 4294967280 }
 0x2e5   :  { %484 = vsyncpa [#allocation4], 1 }

</bundles_post_ra>
